<compile_context>
chip_gen: v5e
topology: v5e:2x2
jax: 0.10.0
libtpu: 0.0.40
codegen_flags: <defaults>
</compile_context>

<pallas_src>
import jax
import jax.numpy as jnp
from jax.experimental import pallas as pl
from jax.experimental.pallas import tpu as pltpu


def _linear_sigmoid_kernel(x_ref, w_ref, b_ref, o_ref):
    # x_ref: (TB, D) VMEM, w_ref: (1, D) VMEM, b_ref: (1,) SMEM, o_ref: (TB, 1) VMEM
    x = x_ref[...]                      # (TB, D)
    w = w_ref[...]                      # (1, D) — lane-dense, broadcasts over batch
    logit = jnp.sum(x * w, axis=-1, keepdims=True) + b_ref[0]   # (TB, 1)
    # sigmoid(z) = 0.5 * (tanh(z/2) + 1): one EUP transcendental, no inf intermediate.
    prob = 0.5 * (jnp.tanh(0.5 * logit) + 1.0)
    o_ref[...] = prob.astype(o_ref.dtype)


def _choose_block_batch(B, D, itemsize=4, vmem_budget_bytes=16 * 1024 * 1024):
    """Pick a batch tile: big enough to amortize per-step overhead, small enough
    that the double-buffered x tiles stay well under VMEM (conservative for v7x)."""
    max_tb = max(8, vmem_budget_bytes // (2 * D * itemsize))
    tb = min(1024, max_tb)
    tb = max(8, (tb // 8) * 8)          # sublane multiple
    b_padded = -(-B // 8) * 8
    return min(tb, b_padded)


def linear_layer_forward(feature_vector, weight, bias, *, block_batch=None):
    """feature_vector: (B, D); weight: (D, 1) (PyTorch W.T layout), (1, D) or (D,);
    bias: (1, 1), (1,) or scalar. Returns sigmoid(x @ W + b) of shape (B, 1) f32."""
    x = feature_vector
    B, D = x.shape
    w = jnp.asarray(weight, jnp.float32).reshape(1, D)   # lane-dense weight
    b = jnp.asarray(bias, jnp.float32).reshape(1,)       # scalar bias for SMEM

    TB = block_batch if block_batch is not None else _choose_block_batch(B, D, x.dtype.itemsize)
    Bp = pl.cdiv(B, TB) * TB
    if Bp != B:
        x = jnp.pad(x, ((0, Bp - B), (0, 0)))

    grid = (Bp // TB,)
    cost = pl.CostEstimate(
        flops=2 * Bp * D,
        transcendentals=Bp,
        bytes_accessed=Bp * D * x.dtype.itemsize + D * 4 + 4 + Bp * 4,
    )

    out = pl.pallas_call(
        _linear_sigmoid_kernel,
        out_shape=jax.ShapeDtypeStruct((Bp, 1), jnp.float32),
        grid_spec=pltpu.PrefetchScalarGridSpec(
            num_scalar_prefetch=0,
            grid=grid,
            in_specs=[
                pl.BlockSpec((TB, D), lambda i: (i, 0)),                  # x: tiled over batch
                pl.BlockSpec((1, D), lambda i: (0, 0)),                   # w: VMEM-resident
                pl.BlockSpec(memory_space=pltpu.MemorySpace.SMEM),        # bias: scalar in SMEM
            ],
            out_specs=pl.BlockSpec((TB, 1), lambda i: (i, 0)),
        ),
        compiler_params=pltpu.CompilerParams(
            dimension_semantics=("parallel",),
        ),
        cost_estimate=cost,
    )(x, w, b)

    return out[:B]


if __name__ == "__main__":
    # Small shapes consistent with the module: feature_dim * num_frames features, 1 output.
    batch = 8
    feature_dim = 32
    num_frames = 4
    in_features = feature_dim * num_frames  # 128

    key = jax.random.PRNGKey(0)
    kx, kw, kb = jax.random.split(key, 3)

    # Deterministic parameter init mimicking nn.Linear: U(-1/sqrt(in), 1/sqrt(in)).
    bound = 1.0 / (in_features ** 0.5)
    weight = jax.random.uniform(kw, (in_features, 1), jnp.float32, -bound, bound)
    bias = jax.random.uniform(kb, (1, 1), jnp.float32, -bound, bound)

    x = jax.random.normal(kx, (batch, in_features), jnp.float32)

    prob = linear_layer_forward(x, weight, bias)
    prob = jax.block_until_ready(prob)

    # Reference check in plain JAX.
    ref = jax.nn.sigmoid(x @ weight + bias)
    assert prob.shape == (batch, 1)
    assert jnp.allclose(prob, ref, atol=1e-5, rtol=1e-5)

    print("KERNEL_OK")
</pallas_src>

<mosaic_0001>
module attributes {stable_mosaic.version = 11 : i64} {
  func.func @_linear_sigmoid_kernel(%arg0: i32, %arg1: memref<8x128xf32, #tpu.memory_space<vmem>>, %arg2: memref<1x128xf32, #tpu.memory_space<vmem>>, %arg3: memref<1xf32, #tpu.memory_space<smem>>, %arg4: memref<8x1xf32, #tpu.memory_space<vmem>>) attributes {dimension_semantics = [#tpu.dimension_semantics<parallel>], iteration_bounds = array<i64: 1>, scalar_prefetch = 0 : i64, scratch_operands = 0 : i64, tpu.core_type = #tpu.core_type<tc>, window_params = [{transform_indices = @transform_0, window_bounds = array<i64: 8, 128>}, {pipeline_mode = #tpu.pipeline_mode<synchronous>, transform_indices = @transform_1, window_bounds = array<i64: 1, 128>}, {transform_indices = @transform_2, window_bounds = array<i64: 1>}, {transform_indices = @transform_3, window_bounds = array<i64: 8, 1>}]} {
    %c0 = arith.constant 0 : index
    %c0_0 = arith.constant 0 : index
    %0 = vector.load %arg1[%c0, %c0_0] : memref<8x128xf32, #tpu.memory_space<vmem>>, vector<8x128xf32>
    %c0_1 = arith.constant 0 : index
    %c0_2 = arith.constant 0 : index
    %1 = vector.load %arg2[%c0_1, %c0_2] : memref<1x128xf32, #tpu.memory_space<vmem>>, vector<1x128xf32>
    %2 = vector.broadcast %1 : vector<1x128xf32> to vector<8x128xf32>
    %3 = arith.mulf %0, %2 : vector<8x128xf32>
    %cst = arith.constant dense<0.000000e+00> : vector<8xf32>
    %4 = vector.multi_reduction <add>, %3, %cst [1] : vector<8x128xf32> to vector<8xf32>
    %5 = vector.shape_cast %4 : vector<8xf32> to vector<8x1xf32>
    %c0_3 = arith.constant 0 : index
    %6 = memref.load %arg3[%c0_3] : memref<1xf32, #tpu.memory_space<smem>>
    %7 = vector.broadcast %6 : f32 to vector<8x1xf32>
    %8 = arith.addf %5, %7 : vector<8x1xf32>
    %cst_4 = arith.constant 5.000000e-01 : f32
    %9 = vector.broadcast %cst_4 : f32 to vector<8x1xf32>
    %10 = arith.mulf %9, %8 : vector<8x1xf32>
    %11 = math.tanh %10 : vector<8x1xf32>
    %cst_5 = arith.constant 1.000000e+00 : f32
    %12 = vector.broadcast %cst_5 : f32 to vector<8x1xf32>
    %13 = arith.addf %11, %12 : vector<8x1xf32>
    %cst_6 = arith.constant 5.000000e-01 : f32
    %14 = vector.broadcast %cst_6 : f32 to vector<8x1xf32>
    %15 = arith.mulf %14, %13 : vector<8x1xf32>
    %c0_7 = arith.constant 0 : index
    %c0_8 = arith.constant 0 : index
    %16 = vector.load %arg4[%c0_7, %c0_8] : memref<8x1xf32, #tpu.memory_space<vmem>>, vector<8x1xf32>
    tpu.vector_store %arg4[%c0_7, %c0_8], %15 {strides = array<i32>} : memref<8x1xf32, #tpu.memory_space<vmem>>, vector<8x1xf32>,
    return
  }
  func.func @transform_0(%arg0: i32) -> (i32, i32) {
    %c0_i32 = arith.constant 0 : i32
    %c0_i32_0 = arith.constant 0 : i32
    return %arg0, %c0_i32 : i32, i32
  }
  func.func @transform_1(%arg0: i32) -> (i32, i32) {
    %c0_i32 = arith.constant 0 : i32
    %c0_i32_0 = arith.constant 0 : i32
    %c0_i32_1 = arith.constant 0 : i32
    return %c0_i32, %c0_i32_0 : i32, i32
  }
  func.func @transform_2(%arg0: i32) -> i32 {
    %c0_i32 = arith.constant 0 : i32
    %c0_i32_0 = arith.constant 0 : i32
    return %c0_i32 : i32
  }
  func.func @transform_3(%arg0: i32) -> (i32, i32) {
    %c0_i32 = arith.constant 0 : i32
    %c0_i32_0 = arith.constant 0 : i32
    return %arg0, %c0_i32 : i32, i32
  }
}

</mosaic_0001>

<bundles_post_ra>
// kernel: tpu_custom_call.1
= control target key start
LH: loop header
LB: loop body
LE: loop exit
PB: predicated region body
PF: predicated region fallthrough
CT: control target
= control target key end

     0   :  { %9 = vsyncpa [#allocation4], 0  ;;  %s81_s15 = smov [#allocation3]   ;;  %s114_s0 = inlined_call_operand.hbm [shape: f32[8,128], index: 0, kind: input, shape index: {}]   ;;  %s115_s1 = inlined_call_operand.vmem [shape: f32[1,128], index: 1, kind: input, shape index: {}]   ;;  %s116_s2 = inlined_call_operand.<no memory space> [shape: f32[1], index: 2, kind: input, shape index: {}]   ;;  %s117_s3 = inlined_call_operand.vmem [shape: f32[8,1], index: 3, kind: output, shape index: {}]  }
   0x1   :  { %s15_s14 = sshll.u32 %s114_s0, 4  ;;  %s17_s16 = sshll.u32 %s81_s15, 4  ;;  %s16_s14 = int_to_ptr.hbm [resolvable:$true] %s15_s14  ;;  %s18_s16 = int_to_ptr.vmem [resolvable:$true] %s17_s16 }
   0x2   :  { %20 = dma.hbm_to_vmem [thread:$0]  %s16_s14, 128, %s18_s16, [#allocation4]  }
   0x3   :  { %79 = dma.done.wait [#allocation4], 128  }
   0x4   :  { %80 = vsyncadd [#allocation4], 4294967168  ;;  %v29_v0 = vld [vmem:[#allocation3] sm:$0xff]  ;;  %v38_v3 = vstv %s116_s2  ;;  %vm44_vm0 = vcmask 7168  }
   0x5   :  { %v52_v1 = vld [vmem:[%s115_s1] ss:$0 sm:$0xff] }
   0x6   :  { %v34_v2 = vmul.f32 %v52_v1, %v29_v0 }
   0x8   :  { %35 = vadd.xlane.f32.xlu0 %v34_v2 }
  0x7b   :  { %v36_v4 = vpop.xlane.xlu0 %35 }
  0x7c   :  { %v39_v5 = vadd.f32 %v38_v3, %v36_v4 }
  0x7e   :  { %v40_v6 = vmul.f32 0.5, %v39_v5 }
  0x80   :  { %53 = vtanh.f32 %v40_v6 }
  0x86   :  { %v54_v7 = vpop.eup %53 }
  0x87   :  { %v42_v8 = vadd.f32 1.0, %v54_v7 }
  0x89   :  { %v43_v9 = vmul.f32 0.5, %v42_v8 }
  0x8b   :  { %45 = vst.msk [vmem:[%s117_s3] sm:$0xff] %vm44_vm0, %v43_v9 }
  0x8c   :  { %50 = vsyncpa [#allocation4], 1 }

</bundles_post_ra>
